<compile_context>
chip_gen: v7x
topology: tpu7x:2x2x1
jax: 0.10.0
libtpu: 0.0.40
codegen_flags: <defaults>
</compile_context>

<pallas_src>
import functools
import math

import jax
import jax.numpy as jnp
from jax.experimental import pallas as pl
from jax.experimental.pallas import tpu as pltpu

LANE = 128      # vreg lane width (last dim)
SUBLANE = 8     # vreg sublane width (second-to-last dim)


def _round_up(n, m):
    return ((n + m - 1) // m) * m


def _pad2d(a, rows, cols):
    r, c = a.shape
    if r == rows and c == cols:
        return a
    return jnp.pad(a, ((0, rows - r), (0, cols - c)))


# ----------------------------------------------------------------------------
# Fused Pallas kernel: all LSTMCell layers + final Linear in one pallas_call.
# ----------------------------------------------------------------------------
def _make_fused_kernel(n_layers, hp_list, has_state):
    """Kernel-body factory.

    Ref order (has_state=True):
        x, h0,c0,...,h_{L-1},c_{L-1},
        wx0,wh0,b0, ..., wx_{L-1},wh_{L-1},b_{L-1}, wlin, blin,
        out, hout0,cout0, ..., hout_{L-1},cout_{L-1}
    Ref order (has_state=False):
        x, wx0,b0, ..., wx_{L-1},b_{L-1}, wlin, blin,
        out, hout0,cout0, ..., hout_{L-1},cout_{L-1}

    Weights wx/wh/wlin are bf16 (gate-slab-major, zero padded); biases, states and
    outputs are f32.  Batch is padded to a multiple of 8, feature dims to 128.
    """
    per_layer_w = 3 if has_state else 2

    def kernel(*refs):
        idx = 0
        x_ref = refs[idx]; idx += 1
        if has_state:
            state_refs = refs[idx:idx + 2 * n_layers]; idx += 2 * n_layers
        w_refs = refs[idx:idx + per_layer_w * n_layers]; idx += per_layer_w * n_layers
        wlin_ref = refs[idx]; idx += 1
        blin_ref = refs[idx]; idx += 1
        out_ref = refs[idx]; idx += 1
        hc_out_refs = refs[idx:idx + 2 * n_layers]; idx += 2 * n_layers

        x_cur = x_ref[...]                       # bf16 input for layer 0
        for li in range(n_layers):               # static Python loop (unrolled)
            hp = hp_list[li]
            xb = x_cur.astype(jnp.bfloat16)      # MXU operand in bf16, f32 accumulate

            if has_state:
                wx = w_refs[3 * li][...]         # bf16 (inp, 4*hp)
                wh = w_refs[3 * li + 1][...]     # bf16 (hp,  4*hp)
                bias = w_refs[3 * li + 2][...]   # f32  (1,   4*hp)
                h_prev = state_refs[2 * li][...]       # f32
                c_prev = state_refs[2 * li + 1][...]   # f32
                gates = (jnp.dot(xb, wx, preferred_element_type=jnp.float32)
                         + jnp.dot(h_prev.astype(jnp.bfloat16), wh,
                                   preferred_element_type=jnp.float32)
                         + bias)
                # Gate slabs are 128-lane multiples -> lane-aligned slices.
                i_g = jax.nn.sigmoid(gates[:, 0 * hp:1 * hp])
                f_g = jax.nn.sigmoid(gates[:, 1 * hp:2 * hp])
                g_g = jnp.tanh(gates[:, 2 * hp:3 * hp])
                o_g = jax.nn.sigmoid(gates[:, 3 * hp:4 * hp])
                c_new = f_g * c_prev + i_g * g_g
            else:
                # Cold-start: h_prev = c_prev = 0.  Skip the h-side matmul entirely,
                # skip the f-gate sigmoid, and c_new = i * g.
                wx = w_refs[2 * li][...]
                bias = w_refs[2 * li + 1][...]
                gates = (jnp.dot(xb, wx, preferred_element_type=jnp.float32) + bias)
                i_g = jax.nn.sigmoid(gates[:, 0 * hp:1 * hp])
                g_g = jnp.tanh(gates[:, 2 * hp:3 * hp])
                o_g = jax.nn.sigmoid(gates[:, 3 * hp:4 * hp])
                c_new = i_g * g_g

            h_new = o_g * jnp.tanh(c_new)
            hc_out_refs[2 * li][...] = h_new
            hc_out_refs[2 * li + 1][...] = c_new

            # Next layer consumes the previous layer's *cell state* (matches the
            # original PyTorch forward).  Dropout(0.5) -> identity (eval mode).
            x_cur = c_new

        # Final Linear; output is a lane-dense (bp, out_p) slab.
        out_ref[...] = (jnp.dot(x_cur.astype(jnp.bfloat16), wlin_ref[...],
                                preferred_element_type=jnp.float32)
                        + blin_ref[...])

    return kernel


@functools.lru_cache(maxsize=None)
def _get_forward_fn(batch, input_size, hidden_dims, output_size, has_state):
    """Builds (and jits) the padded fused forward for a fixed configuration."""
    n_layers = len(hidden_dims)
    batch_p = _round_up(max(batch, 1), SUBLANE)
    input_p = _round_up(input_size, LANE)
    hp_list = tuple(_round_up(h, LANE) for h in hidden_dims)
    inp_list = tuple([input_p] + [hp_list[i - 1] for i in range(1, n_layers)])
    out_p = _round_up(output_size, LANE)

    kernel = _make_fused_kernel(n_layers, hp_list, has_state)
    vmem = pl.BlockSpec(memory_space=pltpu.MemorySpace.VMEM)

    # ---- VMEM budget: size the scoped limit from the actual resident bytes. ----
    arg_bytes = batch_p * input_p * 2                                  # x (bf16)
    if has_state:
        arg_bytes += sum(2 * batch_p * hp * 4 for hp in hp_list)       # h, c (f32)
    for li in range(n_layers):
        arg_bytes += inp_list[li] * 4 * hp_list[li] * 2                # wx (bf16)
        if has_state:
            arg_bytes += hp_list[li] * 4 * hp_list[li] * 2             # wh (bf16)
        arg_bytes += 4 * hp_list[li] * 4                               # bias (f32)
    arg_bytes += hp_list[-1] * out_p * 2 + out_p * 4                   # wlin, blin
    out_bytes = batch_p * out_p * 4 + sum(2 * batch_p * hp * 4 for hp in hp_list)
    vmem_limit = int(min(100 * 1024 * 1024,
                         2 * (arg_bytes + out_bytes) + (4 << 20)))

    n_inputs = 1 + (2 * n_layers if has_state else 0) \
        + ((3 if has_state else 2) * n_layers) + 2

    out_shapes = [jax.ShapeDtypeStruct((batch_p, out_p), jnp.float32)]
    for hp in hp_list:
        out_shapes.append(jax.ShapeDtypeStruct((batch_p, hp), jnp.float32))  # h
        out_shapes.append(jax.ShapeDtypeStruct((batch_p, hp), jnp.float32))  # c

    fused = pl.pallas_call(
        kernel,
        out_shape=tuple(out_shapes),
        in_specs=[vmem] * n_inputs,
        out_specs=tuple([vmem] * len(out_shapes)),
        compiler_params=pltpu.CompilerParams(vmem_limit_bytes=vmem_limit),
    )

    def forward(x, wx_t, wh_t, bias_t, wlin, blin, states_flat):
        x_p = _pad2d(x.astype(jnp.float32), batch_p, input_p).astype(jnp.bfloat16)
        args = [x_p]
        if has_state:
            for li in range(n_layers):
                h = states_flat[2 * li].astype(jnp.float32)
                c = states_flat[2 * li + 1].astype(jnp.float32)
                args.append(_pad2d(h, batch_p, hp_list[li]))
                args.append(_pad2d(c, batch_p, hp_list[li]))
            for li in range(n_layers):
                args += [wx_t[li], wh_t[li], bias_t[li]]
        else:
            for li in range(n_layers):
                args += [wx_t[li], bias_t[li]]
        args += [wlin, blin]

        results = fused(*args)
        out = results[0][:batch, :output_size]
        hs = tuple(results[1 + 2 * li][:batch, :hidden_dims[li]]
                   for li in range(n_layers))
        cs = tuple(results[2 + 2 * li][:batch, :hidden_dims[li]]
                   for li in range(n_layers))
        return out, hs, cs

    return jax.jit(forward)


# ----------------------------------------------------------------------------
# Parameter construction (deterministic, PyTorch-style uniform init) + padding
# ----------------------------------------------------------------------------
def init_params(key, input_size, interior_layer_dimensions, output_size):
    input_p = _round_up(input_size, LANE)
    wx_list, wh_list, bias_list = [], [], []
    lstm_ref = []

    for i, hdim in enumerate(interior_layer_dimensions):
        in_dim = input_size if i == 0 else interior_layer_dimensions[i - 1]
        in_p = input_p if i == 0 else _round_up(interior_layer_dimensions[i - 1], LANE)
        hp = _round_up(hdim, LANE)
        k = 1.0 / math.sqrt(hdim)
        key, k1, k2, k3, k4 = jax.random.split(key, 5)
        w_ih = jax.random.uniform(k1, (4 * hdim, in_dim), jnp.float32, -k, k)
        w_hh = jax.random.uniform(k2, (4 * hdim, hdim), jnp.float32, -k, k)
        b_ih = jax.random.uniform(k3, (4 * hdim,), jnp.float32, -k, k)
        b_hh = jax.random.uniform(k4, (4 * hdim,), jnp.float32, -k, k)

        # Padded, gate-slab-major, bf16 weights.  Rows beyond the true feature dim
        # and lanes beyond the true hidden dim are zero, so padding annihilates.
        wx = jnp.zeros((in_p, 4 * hp), jnp.float32)
        wh = jnp.zeros((hp, 4 * hp), jnp.float32)
        bias = jnp.zeros((1, 4 * hp), jnp.float32)
        for g in range(4):
            wx = wx.at[:in_dim, g * hp:g * hp + hdim].set(
                w_ih[g * hdim:(g + 1) * hdim, :].T)
            wh = wh.at[:hdim, g * hp:g * hp + hdim].set(
                w_hh[g * hdim:(g + 1) * hdim, :].T)
            bias = bias.at[0, g * hp:g * hp + hdim].set(
                b_ih[g * hdim:(g + 1) * hdim] + b_hh[g * hdim:(g + 1) * hdim])
        wx_list.append(wx.astype(jnp.bfloat16))
        wh_list.append(wh.astype(jnp.bfloat16))
        bias_list.append(bias)

        lstm_ref.append({"w_ih_t": w_ih.T, "w_hh_t": w_hh.T,
                         "b": (b_ih + b_hh).reshape(1, 4 * hdim),
                         "hidden_dim": hdim})

    # Final Linear(interior[-1], output_size), padded lane-dense, bf16 weight.
    in_last = interior_layer_dimensions[-1]
    hp_last = _round_up(in_last, LANE)
    out_p = _round_up(output_size, LANE)
    k = 1.0 / math.sqrt(in_last)
    key, k1, k2 = jax.random.split(key, 3)
    w = jax.random.uniform(k1, (output_size, in_last), jnp.float32, -k, k)
    b = jax.random.uniform(k2, (output_size,), jnp.float32, -k, k)
    wlin = (jnp.zeros((hp_last, out_p), jnp.float32)
            .at[:in_last, :output_size].set(w.T).astype(jnp.bfloat16))
    blin = jnp.zeros((1, out_p), jnp.float32).at[0, :output_size].set(b)

    return {
        "pallas": {"wx": tuple(wx_list), "wh": tuple(wh_list),
                   "bias": tuple(bias_list), "wlin": wlin, "blin": blin},
        "ref": {"lstm": lstm_ref,
                "linear": {"w_t": w.T, "b": b.reshape(1, output_size)}},
        "meta": {"input_size": input_size,
                 "hidden_dims": tuple(interior_layer_dimensions),
                 "output_size": output_size},
    }


# ----------------------------------------------------------------------------
# Forward pass matching LSTM_NN.forward
# ----------------------------------------------------------------------------
def lstm_nn_forward(params, x, hidden_array=None, state_array=None):
    meta = params["meta"]
    hidden_dims = meta["hidden_dims"]
    n_layers = len(hidden_dims)
    batch = x.shape[0]

    has_state = not (hidden_array is None or state_array is None)
    if has_state:
        assert len(hidden_array) == n_layers and len(state_array) == n_layers
        states_flat = []
        for li in range(n_layers):
            h, c = hidden_array[li], state_array[li]
            if h is None or c is None:
                h = jnp.zeros((batch, hidden_dims[li]), jnp.float32)
                c = jnp.zeros((batch, hidden_dims[li]), jnp.float32)
            states_flat += [h, c]
        states_flat = tuple(states_flat)
    else:
        states_flat = ()

    fwd = _get_forward_fn(batch, meta["input_size"], hidden_dims,
                          meta["output_size"], has_state)
    p = params["pallas"]
    out, hs, cs = fwd(x, p["wx"], p["wh"], p["bias"], p["wlin"], p["blin"],
                      states_flat)
    return out, list(hs), list(cs)


# ----------------------------------------------------------------------------
# Pure-JAX reference for correctness checks (mimics bf16 matmul operands)
# ----------------------------------------------------------------------------
def _bf16_dot(a, b):
    return jnp.dot(a.astype(jnp.bfloat16), b.astype(jnp.bfloat16),
                   preferred_element_type=jnp.float32)


def _ref_cell(x, h, c, p):
    gates = _bf16_dot(x, p["w_ih_t"]) + _bf16_dot(h, p["w_hh_t"]) + p["b"]
    hd = p["hidden_dim"]
    i = jax.nn.sigmoid(gates[:, :hd])
    f = jax.nn.sigmoid(gates[:, hd:2 * hd])
    g = jnp.tanh(gates[:, 2 * hd:3 * hd])
    o = jax.nn.sigmoid(gates[:, 3 * hd:])
    c_new = f * c + i * g
    return o * jnp.tanh(c_new), c_new


def _ref_forward(params, x, hidden_array=None, state_array=None):
    ref = params["ref"]
    batch = x.shape[0]
    n_layers = len(ref["lstm"])
    if hidden_array is None or state_array is None:
        hidden_array = [None] * n_layers
        state_array = [None] * n_layers
    hs, cs = [], []
    x_cur = x
    for i, p in enumerate(ref["lstm"]):
        h, c = hidden_array[i], state_array[i]
        if h is None or c is None:
            h = jnp.zeros((batch, p["hidden_dim"]), jnp.float32)
            c = jnp.zeros((batch, p["hidden_dim"]), jnp.float32)
        h_new, c_new = _ref_cell(x_cur, h, c, p)
        hs.append(h_new)
        cs.append(c_new)
        x_cur = c_new
    out = _bf16_dot(cs[-1], ref["linear"]["w_t"]) + ref["linear"]["b"]
    return out, hs, cs


# ----------------------------------------------------------------------------
if __name__ == "__main__":
    key = jax.random.PRNGKey(0)

    batch = 2
    input_size = 16
    interior_layer_dimensions = [32, 32]
    output_size = 10

    key, pkey, xkey = jax.random.split(key, 3)
    params = init_params(pkey, input_size, interior_layer_dimensions, output_size)
    x = jax.random.normal(xkey, (batch, input_size), jnp.float32)

    # First call: hidden / state are None (optimized cold-start kernel variant).
    out, hidden, state = lstm_nn_forward(params, x, None, None)
    # Second call: carry the recurrent state (as the PyTorch loop would).
    out2, hidden2, state2 = lstm_nn_forward(params, x, hidden, state)

    jax.block_until_ready(out)
    jax.block_until_ready(out2)

    ref_out, ref_h, ref_c = _ref_forward(params, x)
    # Feed the kernel's own state into the reference so the second-step check
    # isolates the single-step error (bf16 weights are used in both paths).
    ref_out2, _, _ = _ref_forward(params, x, hidden, state)

    atol = rtol = 5e-3
    assert out.shape == (batch, output_size)
    assert jnp.allclose(out, ref_out, atol=atol, rtol=rtol)
    assert jnp.allclose(out2, ref_out2, atol=atol, rtol=rtol)
    for li in range(len(interior_layer_dimensions)):
        assert jnp.allclose(hidden[li], ref_h[li], atol=atol, rtol=rtol)
        assert jnp.allclose(state[li], ref_c[li], atol=atol, rtol=rtol)

    print("KERNEL_OK")
</pallas_src>

<mosaic_0001>
module attributes {stable_mosaic.version = 11 : i64} {
  func.func @kernel(%arg0: memref<8x128xbf16, #tpu.memory_space<vmem>>, %arg1: memref<128x512xbf16, #tpu.memory_space<vmem>>, %arg2: memref<1x512xf32, #tpu.memory_space<vmem>>, %arg3: memref<128x512xbf16, #tpu.memory_space<vmem>>, %arg4: memref<1x512xf32, #tpu.memory_space<vmem>>, %arg5: memref<128x128xbf16, #tpu.memory_space<vmem>>, %arg6: memref<1x128xf32, #tpu.memory_space<vmem>>, %arg7: memref<8x128xf32, #tpu.memory_space<vmem>>, %arg8: memref<8x128xf32, #tpu.memory_space<vmem>>, %arg9: memref<8x128xf32, #tpu.memory_space<vmem>>, %arg10: memref<8x128xf32, #tpu.memory_space<vmem>>, %arg11: memref<8x128xf32, #tpu.memory_space<vmem>>) attributes {dimension_semantics = [], scalar_prefetch = 0 : i64, scratch_operands = 0 : i64, tpu.core_type = #tpu.core_type<tc>} {
    %c0 = arith.constant 0 : index
    %c0_0 = arith.constant 0 : index
    %0 = vector.load %arg0[%c0, %c0_0] : memref<8x128xbf16, #tpu.memory_space<vmem>>, vector<8x128xbf16>
    %c0_1 = arith.constant 0 : index
    %c0_2 = arith.constant 0 : index
    %1 = vector.load %arg1[%c0_1, %c0_2] : memref<128x512xbf16, #tpu.memory_space<vmem>>, vector<128x512xbf16>
    %c0_3 = arith.constant 0 : index
    %c0_4 = arith.constant 0 : index
    %2 = vector.load %arg2[%c0_3, %c0_4] : memref<1x512xf32, #tpu.memory_space<vmem>>, vector<1x512xf32>
    %cst = arith.constant dense<0.000000e+00> : vector<8x512xf32>
    %3 = tpu.matmul %0, %1, %cst {dimension_numbers = #tpu.dot_dimension_numbers<[1], [0], [0], [1], [0, 0, 1, 1], [], []>} : vector<8x128xbf16>, vector<128x512xbf16>, vector<8x512xf32> -> vector<8x512xf32>
    %4 = vector.broadcast %2 : vector<1x512xf32> to vector<8x512xf32>
    %5 = arith.addf %3, %4 : vector<8x512xf32>
    %6 = vector.extract_strided_slice %5 {offsets = [0, 0], sizes = [8, 128], strides = [1, 1]} : vector<8x512xf32> to vector<8x128xf32>
    %7 = arith.negf %6 : vector<8x128xf32>
    %8 = math.exp %7 : vector<8x128xf32>
    %cst_5 = arith.constant 1.000000e+00 : f32
    %9 = vector.broadcast %cst_5 : f32 to vector<8x128xf32>
    %10 = arith.addf %9, %8 : vector<8x128xf32>
    %11 = arith.divf %9, %10 : vector<8x128xf32>
    %12 = vector.extract_strided_slice %5 {offsets = [0, 256], sizes = [8, 128], strides = [1, 1]} : vector<8x512xf32> to vector<8x128xf32>
    %13 = math.tanh %12 : vector<8x128xf32>
    %14 = vector.extract_strided_slice %5 {offsets = [0, 384], sizes = [8, 128], strides = [1, 1]} : vector<8x512xf32> to vector<8x128xf32>
    %15 = arith.negf %14 : vector<8x128xf32>
    %16 = math.exp %15 : vector<8x128xf32>
    %cst_6 = arith.constant 1.000000e+00 : f32
    %17 = vector.broadcast %cst_6 : f32 to vector<8x128xf32>
    %18 = arith.addf %17, %16 : vector<8x128xf32>
    %19 = arith.divf %17, %18 : vector<8x128xf32>
    %20 = arith.mulf %11, %13 : vector<8x128xf32>
    %21 = math.tanh %20 : vector<8x128xf32>
    %22 = arith.mulf %19, %21 : vector<8x128xf32>
    %c0_7 = arith.constant 0 : index
    %c0_8 = arith.constant 0 : index
    %23 = vector.load %arg8[%c0_7, %c0_8] : memref<8x128xf32, #tpu.memory_space<vmem>>, vector<8x128xf32>
    tpu.vector_store %arg8[%c0_7, %c0_8], %22 {strides = array<i32>} : memref<8x128xf32, #tpu.memory_space<vmem>>, vector<8x128xf32>,
    %c0_9 = arith.constant 0 : index
    %c0_10 = arith.constant 0 : index
    %24 = vector.load %arg9[%c0_9, %c0_10] : memref<8x128xf32, #tpu.memory_space<vmem>>, vector<8x128xf32>
    tpu.vector_store %arg9[%c0_9, %c0_10], %20 {strides = array<i32>} : memref<8x128xf32, #tpu.memory_space<vmem>>, vector<8x128xf32>,
    %25 = arith.truncf %20 : vector<8x128xf32> to vector<8x128xbf16>
    %c0_11 = arith.constant 0 : index
    %c0_12 = arith.constant 0 : index
    %26 = vector.load %arg3[%c0_11, %c0_12] : memref<128x512xbf16, #tpu.memory_space<vmem>>, vector<128x512xbf16>
    %c0_13 = arith.constant 0 : index
    %c0_14 = arith.constant 0 : index
    %27 = vector.load %arg4[%c0_13, %c0_14] : memref<1x512xf32, #tpu.memory_space<vmem>>, vector<1x512xf32>
    %cst_15 = arith.constant dense<0.000000e+00> : vector<8x512xf32>
    %28 = tpu.matmul %25, %26, %cst_15 {dimension_numbers = #tpu.dot_dimension_numbers<[1], [0], [0], [1], [0, 0, 1, 1], [], []>} : vector<8x128xbf16>, vector<128x512xbf16>, vector<8x512xf32> -> vector<8x512xf32>
    %29 = vector.broadcast %27 : vector<1x512xf32> to vector<8x512xf32>
    %30 = arith.addf %28, %29 : vector<8x512xf32>
    %31 = vector.extract_strided_slice %30 {offsets = [0, 0], sizes = [8, 128], strides = [1, 1]} : vector<8x512xf32> to vector<8x128xf32>
    %32 = arith.negf %31 : vector<8x128xf32>
    %33 = math.exp %32 : vector<8x128xf32>
    %cst_16 = arith.constant 1.000000e+00 : f32
    %34 = vector.broadcast %cst_16 : f32 to vector<8x128xf32>
    %35 = arith.addf %34, %33 : vector<8x128xf32>
    %36 = arith.divf %34, %35 : vector<8x128xf32>
    %37 = vector.extract_strided_slice %30 {offsets = [0, 256], sizes = [8, 128], strides = [1, 1]} : vector<8x512xf32> to vector<8x128xf32>
    %38 = math.tanh %37 : vector<8x128xf32>
    %39 = vector.extract_strided_slice %30 {offsets = [0, 384], sizes = [8, 128], strides = [1, 1]} : vector<8x512xf32> to vector<8x128xf32>
    %40 = arith.negf %39 : vector<8x128xf32>
    %41 = math.exp %40 : vector<8x128xf32>
    %cst_17 = arith.constant 1.000000e+00 : f32
    %42 = vector.broadcast %cst_17 : f32 to vector<8x128xf32>
    %43 = arith.addf %42, %41 : vector<8x128xf32>
    %44 = arith.divf %42, %43 : vector<8x128xf32>
    %45 = arith.mulf %36, %38 : vector<8x128xf32>
    %46 = math.tanh %45 : vector<8x128xf32>
    %47 = arith.mulf %44, %46 : vector<8x128xf32>
    %c0_18 = arith.constant 0 : index
    %c0_19 = arith.constant 0 : index
    %48 = vector.load %arg10[%c0_18, %c0_19] : memref<8x128xf32, #tpu.memory_space<vmem>>, vector<8x128xf32>
    tpu.vector_store %arg10[%c0_18, %c0_19], %47 {strides = array<i32>} : memref<8x128xf32, #tpu.memory_space<vmem>>, vector<8x128xf32>,
    %c0_20 = arith.constant 0 : index
    %c0_21 = arith.constant 0 : index
    %49 = vector.load %arg11[%c0_20, %c0_21] : memref<8x128xf32, #tpu.memory_space<vmem>>, vector<8x128xf32>
    tpu.vector_store %arg11[%c0_20, %c0_21], %45 {strides = array<i32>} : memref<8x128xf32, #tpu.memory_space<vmem>>, vector<8x128xf32>,
    %50 = arith.truncf %45 : vector<8x128xf32> to vector<8x128xbf16>
    %c0_22 = arith.constant 0 : index
    %c0_23 = arith.constant 0 : index
    %51 = vector.load %arg5[%c0_22, %c0_23] : memref<128x128xbf16, #tpu.memory_space<vmem>>, vector<128x128xbf16>
    %cst_24 = arith.constant dense<0.000000e+00> : vector<8x128xf32>
    %52 = tpu.matmul %50, %51, %cst_24 {dimension_numbers = #tpu.dot_dimension_numbers<[1], [0], [0], [1], [0, 0, 1, 1], [], []>} : vector<8x128xbf16>, vector<128x128xbf16>, vector<8x128xf32> -> vector<8x128xf32>
    %c0_25 = arith.constant 0 : index
    %c0_26 = arith.constant 0 : index
    %53 = vector.load %arg6[%c0_25, %c0_26] : memref<1x128xf32, #tpu.memory_space<vmem>>, vector<1x128xf32>
    %54 = vector.broadcast %53 : vector<1x128xf32> to vector<8x128xf32>
    %55 = arith.addf %52, %54 : vector<8x128xf32>
    %c0_27 = arith.constant 0 : index
    %c0_28 = arith.constant 0 : index
    %56 = vector.load %arg7[%c0_27, %c0_28] : memref<8x128xf32, #tpu.memory_space<vmem>>, vector<8x128xf32>
    tpu.vector_store %arg7[%c0_27, %c0_28], %55 {strides = array<i32>} : memref<8x128xf32, #tpu.memory_space<vmem>>, vector<8x128xf32>,
    return
  }
}

</mosaic_0001>

<bundles_post_ra>
// kernel: forward.1
= control target key start
LH: loop header
LB: loop body
LE: loop exit
PB: predicated region body
PF: predicated region fallthrough
CT: control target
= control target key end

     0   :  { %17 = vsyncpa [#allocation3], 0  ;;  %s1301_s0 = inlined_call_operand.vmem [shape: bf16[8,128], index: 0, kind: input, shape index: {}]   ;;  %s1302_s1 = inlined_call_operand.hbm [shape: bf16[128,512], index: 1, kind: input, shape index: {}]   ;;  %s1303_s2 = inlined_call_operand.vmem [shape: f32[1,512], index: 2, kind: input, shape index: {}]   ;;  %s1304_s3 = inlined_call_operand.hbm [shape: bf16[128,512], index: 3, kind: input, shape index: {}]   ;;  %s1305_s4 = inlined_call_operand.vmem [shape: f32[1,512], index: 4, kind: input, shape index: {}]   ;;  %s1306_s5 = inlined_call_operand.hbm [shape: bf16[128,128], index: 5, kind: input, shape index: {}]   ;;  %s1307_s6 = inlined_call_operand.vmem [shape: f32[1,128], index: 6, kind: input, shape index: {}]   ;;  %s1308_s7 = inlined_call_operand.vmem [shape: f32[8,128], index: 7, kind: output, shape index: {0}]   ;;  %s1309_s8 = inlined_call_operand.vmem [shape: f32[8,128], index: 8, kind: output, shape index: {1}]   ;;  %s1310_s9 = inlined_call_operand.vmem [shape: f32[8,128], index: 9, kind: output, shape index: {2}]   ;;  %s1311_s10 = inlined_call_operand.vmem [shape: f32[8,128], index: 10, kind: output, shape index: {3}]   ;;  %s1312_s11 = inlined_call_operand.vmem [shape: f32[8,128], index: 11, kind: output, shape index: {4}]  }
   0x1   :  { %18 = vsyncpa [#allocation5], 0  ;;  %s1140_s17 = smov [#allocation4]   ;;  %s1141_s19 = smov [#allocation2]  }
   0x2   :  { %s40_s18 = sshll.u32 %s1140_s17, 4  ;;  %s26_s20 = sshll.u32 %s1141_s19, 4  ;;  %s41_s18 = int_to_ptr.vmem [resolvable:$true] %s40_s18  ;;  %s1210_s20 = int_to_ptr.vmem [resolvable:$true] %s26_s20 }
   0x3   :  { %s1070_s23 = scalar_lea.hbm %s1304_s3, 4096 }
   0x4   :  { %p1071_p0 = scmp.ne.s32.totalorder %s1304_s3, %s1070_s23  ;;  %p1074_p1 = scmp.lt.u32.totalorder %s1070_s23, %s1304_s3 }
   0x6   :  { %p1076_p2 = pnand %p1074_p1, %p1071_p0 }
   0x8   :  { %1079 = shalt.err (!%p1076_p2)
}
   0x9   :  { %s1080_s28 = scalar_lea.vmem %s41_s18, 4096  ;;  %p1085_p4 = scmp.lt.s32.totalorder %s41_s18, %s41_s18 }
   0xa   :  { %p1081_p3 = scmp.ne.s32.totalorder %s41_s18, %s1080_s28  ;;  %p1086_p5 = scmp.lt.s32.totalorder %s1080_s28, %s1080_s28 }
   0xc   :  { %p1087_p6 = por %p1086_p5, %p1085_p4 }
   0xe   :  { %p1088_p7 = pnand %p1087_p6, %p1081_p3 }
  0x10   :  { %1091 = shalt.err (!%p1088_p7)
}
  0x11   :  { %s1142_s29 = smov 256   ;;  %s1143_s30 = smov 16  }
  0x12   :  { %46 = dma.hbm_to_vmem [thread:$0]  %s1304_s3, 4096, %s41_s18, [#allocation5], %s1142_s29, %s1142_s29, %s1143_s30  }
  0x13   :  { %s1092_s16 = scalar_lea.hbm %s1302_s1, 4096 }
  0x14   :  { %p1093_p8 = scmp.ne.s32.totalorder %s1302_s1, %s1092_s16  ;;  %p1096_p9 = scmp.lt.u32.totalorder %s1092_s16, %s1302_s1 }
  0x16   :  { %p1098_p10 = pnand %p1096_p9, %p1093_p8 }
  0x18   :  { %1101 = shalt.err (!%p1098_p10)
}
  0x19   :  { %s1102_s23 = scalar_lea.vmem %s1210_s20, 4096  ;;  %p1107_p12 = scmp.lt.s32.totalorder %s1210_s20, %s1210_s20 }
  0x1a   :  { %p1103_p11 = scmp.ne.s32.totalorder %s1210_s20, %s1102_s23  ;;  %p1108_p13 = scmp.lt.s32.totalorder %s1102_s23, %s1102_s23 }
  0x1c   :  { %p1109_p0 = por %p1108_p13, %p1107_p12 }
  0x1e   :  { %p1110_p1 = pnand %p1109_p0, %p1103_p11 }
  0x20   :  { %1113 = shalt.err (!%p1110_p1)
}
  0x21   :  { %32 = dma.hbm_to_vmem [thread:$0]  %s1302_s1, 4096, %s1210_s20, [#allocation3], %s1142_s29, %s1142_s29, %s1143_s30  }
  0x22   :  { %s1144_s24 = smov [#allocation6]   ;;  %s1114_s28 = scalar_lea.hbm %s1306_s5, 1024 }
  0x23   :  { %s54_s25 = sshll.u32 %s1144_s24, 4  ;;  %p1115_p2 = scmp.ne.s32.totalorder %s1306_s5, %s1114_s28  ;;  %s55_s25 = int_to_ptr.vmem [resolvable:$true] %s54_s25 }
  0x24   :  { %p1118_p3 = scmp.lt.u32.totalorder %s1114_s28, %s1306_s5 }
  0x26   :  { %p1120_p4 = pnand %p1118_p3, %p1115_p2 }
  0x28   :  { %1123 = shalt.err (!%p1120_p4)
}
  0x29   :  { %s1124_s16 = scalar_lea.vmem %s55_s25, 1024  ;;  %p1129_p6 = scmp.lt.s32.totalorder %s55_s25, %s55_s25 }
  0x2a   :  { %p1125_p5 = scmp.ne.s32.totalorder %s55_s25, %s1124_s16  ;;  %p1130_p7 = scmp.lt.s32.totalorder %s1124_s16, %s1124_s16 }
  0x2c   :  { %p1131_p8 = por %p1130_p7, %p1129_p6 }
  0x2e   :  { %p1132_p9 = pnand %p1131_p8, %p1125_p5 }
  0x30   :  { %1135 = shalt.err (!%p1132_p9)
}
  0x31   :  { %s1145_s1 = smov 64   ;;  %s1146_s20 = smov 4  }
  0x32   :  { %60 = dma.hbm_to_vmem [thread:$0]  %s1306_s5, 1024, %s55_s25, [#allocation5], %s1145_s1, %s1145_s1, %s1146_s20  }
  0x33   :  { %1136 = dma.done.wait [#allocation3], 4096  }
  0x34   :  { %1137 = vsyncadd [#allocation3], 4294963200 }
  0x35   :  { %1138 = dma.done.wait [#allocation5], 5120  }
  0x36   :  { %1139 = vsyncadd [#allocation5], 4294962176  ;;  %v1147_v0 = vmov 0   ;;  %v942_v1 = vld [vmem:[#allocation2 + $0x4] ss:$16 sps:$4 sm:$0xff]   ;;  %vm1149_vm0 = vmmov 0  }
  0x37   :  { %315 = vmatprep.mubr.bf16.mxu0 %v1147_v0  ;;  %355 = vmatprep.mubr.bf16.mxu1 %v1147_v0  ;;  %v944_v2 = vld [vmem:[#allocation2] ss:$16 sps:$4 sm:$0xff]   ;;  %v945_v3 = vld [vmem:[#allocation2 + $0x24] ss:$16 sps:$4 sm:$0xff]   ;;  %v953_v6 = vld [vmem:[#allocation2 + $0xc] ss:$16 sps:$4 sm:$0xff]  }
  0x38   :  { %283 = vmatprep.subr.bf16.mxu0 %v942_v1  ;;  %v947_v4 = vld [vmem:[#allocation2 + $0x20] ss:$16 sps:$4 sm:$0xff]   ;;  %v948_v5 = vld [vmem:[#allocation2 + $0x44] ss:$16 sps:$4 sm:$0xff]   ;;  %v956_v7 = vld [vmem:[#allocation2 + $0x8] ss:$16 sps:$4 sm:$0xff]   ;;  %323 = vmatprep.subr.bf16.mxu1 %v953_v6 }
  0x39   :  { %284 = vmatpush1.bf16.msra.mxu0 %v944_v2  ;;  %v950_v8 = vld [vmem:[#allocation2 + $0x40] ss:$16 sps:$4 sm:$0xff]   ;;  %v951_v9 = vld [vmem:[#allocation2 + $0x64] ss:$16 sps:$4 sm:$0xff]   ;;  %324 = vmatpush1.bf16.msra.mxu1 %v956_v7  ;;  %v959_v10 = vld [vmem:[#allocation2 + $0x2c] ss:$16 sps:$4 sm:$0xff]   ;;  %v108_v2 = vlaneseq }
  0x3a   :  { %285 = vmatprep.subr.bf16.mxu0 %v945_v3  ;;  %v962_v11 = vld [vmem:[#allocation2 + $0x28] ss:$16 sps:$4 sm:$0xff]   ;;  %325 = vmatprep.subr.bf16.mxu1 %v959_v10  ;;  %v955_v12 = vld [vmem:[#allocation2 + $0x60] ss:$16 sps:$4 sm:$0xff]   ;;  %v957_v13 = vld [vmem:[#allocation2 + $0x84] ss:$16 sps:$4 sm:$0xff]  }
  0x3b   :  { %v965_v14 = vld [vmem:[#allocation2 + $0x4c] ss:$16 sps:$4 sm:$0xff]   ;;  %v968_v15 = vld [vmem:[#allocation2 + $0x48] ss:$16 sps:$4 sm:$0xff]   ;;  %v961_v17 = vld [vmem:[#allocation2 + $0x80] ss:$16 sps:$4 sm:$0xff]  }
  0x3c   :  { %v971_v16 = vld [vmem:[#allocation2 + $0x6c] ss:$16 sps:$4 sm:$0xff]   ;;  %v963_v18 = vld [vmem:[#allocation2 + $0xa4] ss:$16 sps:$4 sm:$0xff]   ;;  %v974_v19 = vld [vmem:[#allocation2 + $0x68] ss:$16 sps:$4 sm:$0xff]  }
  0x3d   :  { %286 = vmatpush1.bf16.msra.mxu0 %v947_v4  ;;  %326 = vmatpush1.bf16.msra.mxu1 %v962_v11  ;;  %v977_v20 = vld [vmem:[#allocation2 + $0x8c] ss:$16 sps:$4 sm:$0xff]   ;;  %v967_v21 = vld [vmem:[#allocation2 + $0xa0] ss:$16 sps:$4 sm:$0xff]   ;;  %v969_v22 = vld [vmem:[#allocation2 + $0xc4] ss:$16 sps:$4 sm:$0xff]  }
  0x3e   :  { %287 = vmatprep.subr.bf16.mxu0 %v948_v5  ;;  %327 = vmatprep.subr.bf16.mxu1 %v965_v14  ;;  %v980_v23 = vld [vmem:[#allocation2 + $0x88] ss:$16 sps:$4 sm:$0xff]   ;;  %v973_v24 = vld [vmem:[#allocation2 + $0xc0] ss:$16 sps:$4 sm:$0xff]   ;;  %v981_v25 = vld [vmem:[#allocation2 + $0xac] ss:$16 sps:$4 sm:$0xff]  }
  0x3f   :  { %v975_v26 = vld [vmem:[#allocation2 + $0xe4] ss:$16 sps:$4 sm:$0xff]   ;;  %v983_v27 = vld [vmem:[#allocation2 + $0xa8] ss:$16 sps:$4 sm:$0xff]   ;;  %v984_v28 = vld [vmem:[#allocation2 + $0xcc] ss:$16 sps:$4 sm:$0xff]  }
  0x40   :  { %v979_v29 = vld [vmem:[#allocation2 + $0xe0] ss:$16 sps:$4 sm:$0xff]   ;;  %v986_v30 = vld [vmem:[#allocation2 + $0xc8] ss:$16 sps:$4 sm:$0xff]   ;;  %v987_v31 = vld [vmem:[#allocation2 + $0xec] ss:$16 sps:$4 sm:$0xff]  }
  0x41   :  { %288 = vmatpush1.bf16.msra.mxu0 %v950_v8  ;;  %328 = vmatpush1.bf16.msra.mxu1 %v968_v15  ;;  %v73_v32 = vld [vmem:[%s1301_s0] sm:$0xf]  ;;  %v992_v34 = vld [vmem:[#allocation4 + $0x4] ss:$16 sps:$4 sm:$0xff]   ;;  %v995_v35 = vld [vmem:[#allocation4 + $0xc] ss:$16 sps:$4 sm:$0xff]  }
  0x42   :  { %289 = vmatprep.subr.bf16.mxu0 %v951_v9  ;;  %329 = vmatprep.subr.bf16.mxu1 %v971_v16  ;;  %v989_v33 = vld [vmem:[#allocation2 + $0xe8] ss:$16 sps:$4 sm:$0xff]   ;;  %v990_v36 = vld [vmem:[#allocation4] ss:$16 sps:$4 sm:$0xff]   ;;  %v998_v38 = vld [vmem:[#allocation4 + $0x24] ss:$16 sps:$4 sm:$0xff]  }
  0x43   :  { %v993_v37 = vld [vmem:[#allocation4 + $0x8] ss:$16 sps:$4 sm:$0xff]   ;;  %v1001_v39 = vld [vmem:[#allocation4 + $0x2c] ss:$16 sps:$4 sm:$0xff]   ;;  %v996_v40 = vld [vmem:[#allocation4 + $0x20] ss:$16 sps:$4 sm:$0xff]  }
  0x44   :  { %v999_v41 = vld [vmem:[#allocation4 + $0x28] ss:$16 sps:$4 sm:$0xff]   ;;  %v1004_v42 = vld [vmem:[#allocation4 + $0x44] ss:$16 sps:$4 sm:$0xff]   ;;  %v1007_v43 = vld [vmem:[#allocation4 + $0x4c] ss:$16 sps:$4 sm:$0xff]  }
  0x45   :  { %290 = vmatpush1.bf16.msra.mxu0 %v955_v12  ;;  %330 = vmatpush1.bf16.msra.mxu1 %v974_v19  ;;  %v1002_v44 = vld [vmem:[#allocation4 + $0x40] ss:$16 sps:$4 sm:$0xff]   ;;  %v1005_v45 = vld [vmem:[#allocation4 + $0x48] ss:$16 sps:$4 sm:$0xff]   ;;  %v1010_v46 = vld [vmem:[#allocation4 + $0x64] ss:$16 sps:$4 sm:$0xff]  }
  0x46   :  { %291 = vmatprep.subr.bf16.mxu0 %v957_v13  ;;  %331 = vmatprep.subr.bf16.mxu1 %v977_v20  ;;  %v1013_v47 = vld [vmem:[#allocation4 + $0x6c] ss:$16 sps:$4 sm:$0xff]   ;;  %v1008_v48 = vld [vmem:[#allocation4 + $0x60] ss:$16 sps:$4 sm:$0xff]   ;;  %v1011_v49 = vld [vmem:[#allocation4 + $0x68] ss:$16 sps:$4 sm:$0xff]  }
  0x47   :  { %v1016_v50 = vld [vmem:[#allocation4 + $0x84] ss:$16 sps:$4 sm:$0xff]   ;;  %v1019_v51 = vld [vmem:[#allocation4 + $0x8c] ss:$16 sps:$4 sm:$0xff]   ;;  %v1014_v52 = vld [vmem:[#allocation4 + $0x80] ss:$16 sps:$4 sm:$0xff]  }
  0x48   :  { %v1017_v53 = vld [vmem:[#allocation4 + $0x88] ss:$16 sps:$4 sm:$0xff]   ;;  %v1022_v54 = vld [vmem:[#allocation4 + $0xa4] ss:$16 sps:$4 sm:$0xff]   ;;  %v1025_v55 = vld [vmem:[#allocation4 + $0xac] ss:$16 sps:$4 sm:$0xff]  }
  0x49   :  { %292 = vmatpush1.bf16.msra.mxu0 %v961_v17  ;;  %332 = vmatpush1.bf16.msra.mxu1 %v980_v23  ;;  %v1020_v56 = vld [vmem:[#allocation4 + $0xa0] ss:$16 sps:$4 sm:$0xff]   ;;  %v1023_v57 = vld [vmem:[#allocation4 + $0xa8] ss:$16 sps:$4 sm:$0xff]   ;;  %v1028_v58 = vld [vmem:[#allocation4 + $0xc4] ss:$16 sps:$4 sm:$0xff]  }
  0x4a   :  { %293 = vmatprep.subr.bf16.mxu0 %v963_v18  ;;  %333 = vmatprep.subr.bf16.mxu1 %v981_v25  ;;  %v1031_v59 = vld [vmem:[#allocation4 + $0xcc] ss:$16 sps:$4 sm:$0xff]   ;;  %v1026_v60 = vld [vmem:[#allocation4 + $0xc0] ss:$16 sps:$4 sm:$0xff]   ;;  %v1029_v61 = vld [vmem:[#allocation4 + $0xc8] ss:$16 sps:$4 sm:$0xff]  }
  0x4b   :  { %v1034_v62 = vld [vmem:[#allocation4 + $0xe4] ss:$16 sps:$4 sm:$0xff]   ;;  %v1037_v63 = vld [vmem:[#allocation4 + $0xec] ss:$16 sps:$4 sm:$0xff]   ;;  %v1035_v1 = vld [vmem:[#allocation4 + $0xe8] ss:$16 sps:$4 sm:$0xff]  }
  0x4c   :  { %v1260_v3 = vshrl.u32 %v108_v2, 7  ;;  %v106_v5 = vld [vmem:[%s1303_s2] sm:$0xf] }
  0x4d   :  { %294 = vmatpush1.bf16.msra.mxu0 %v967_v21  ;;  %334 = vmatpush1.bf16.msra.mxu1 %v983_v27 }
  0x4e   :  { %295 = vmatprep.subr.bf16.mxu0 %v969_v22  ;;  %335 = vmatprep.subr.bf16.mxu1 %v984_v28  ;;  %v110_v4 = vsub.s32 0, %v1260_v3  ;;  %v118_v7 = vsub.s32 3, %v1260_v3  ;;  %v114_v15 = vsub.s32 2, %v1260_v3 }
  0x50   :  { %v111_v6 = vrot.slane %v106_v5, %v110_v4  ;;  %v119_v14 = vrot.slane %v106_v5, %v118_v7  ;;  %v115_v20 = vrot.slane %v106_v5, %v114_v15 }
  0x51   :  { %296 = vmatpush1.bf16.msra.mxu0 %v973_v24  ;;  %336 = vmatpush1.bf16.msra.mxu1 %v986_v30 }
  0x52   :  { %297 = vmatprep.subr.bf16.mxu0 %v975_v26  ;;  %337 = vmatprep.subr.bf16.mxu1 %v987_v31 }
  0x55   :  { %298 = vmatpush1.bf16.msra.mxu0 %v979_v29  ;;  %338 = vmatpush1.bf16.msra.mxu1 %v989_v33 }
  0x56   :  { %592 = vmatprep.subr.bf16.mxu0 %v992_v34  ;;  %632 = vmatprep.subr.bf16.mxu1 %v995_v35  ;;  %v1038_v35 = vld [vmem:[#allocation6] sm:$0xff]  }
  0x58   :  { %316 = vmatmul.mubr.bf16.vlgmr.msra.gmra.mrb[0].mxu0 %v73_v32  ;;  %356 = vmatmul.mubr.bf16.vlgmr.msra.gmra.mrb[0].mxu1 %v73_v32 }
  0x59   :  { %624 = vmatprep.mubr.bf16.mxu0 %v1147_v0  ;;  %664 = vmatprep.mubr.bf16.mxu1 %v1147_v0  ;;  %v1032_v0 = vld [vmem:[#allocation4 + $0xe0] ss:$16 sps:$4 sm:$0xff]  }
  0x5a   :  { %593 = vmatpush1.bf16.msra.mxu0 %v990_v36  ;;  %633 = vmatpush1.bf16.msra.mxu1 %v993_v37  ;;  %v1148_v36 = vmov 0.0   ;;  %v1039_v37 = vld [vmem:[#allocation6 + $0x8] sm:$0xff]  }
  0x5b   :  { %594 = vmatprep.subr.bf16.mxu0 %v998_v38  ;;  %634 = vmatprep.subr.bf16.mxu1 %v1001_v39  ;;  %v1040_v38 = vld [vmem:[#allocation6 + $0x10] sm:$0xff]   ;;  %v1041_v39 = vld [vmem:[#allocation6 + $0x18] sm:$0xff]  }
  0x5e   :  { %595 = vmatpush1.bf16.msra.mxu0 %v996_v40  ;;  %635 = vmatpush1.bf16.msra.mxu1 %v999_v41  ;;  %v1042_v40 = vld [vmem:[#allocation6 + $0x20] sm:$0xff]   ;;  %v1043_v41 = vld [vmem:[#allocation6 + $0x28] sm:$0xff]  }
  0x5f   :  { %596 = vmatprep.subr.bf16.mxu0 %v1004_v42  ;;  %636 = vmatprep.subr.bf16.mxu1 %v1007_v43  ;;  %v1044_v42 = vld [vmem:[#allocation6 + $0x30] sm:$0xff]   ;;  %v1045_v43 = vld [vmem:[#allocation6 + $0x38] sm:$0xff]  }
  0x62   :  { %597 = vmatpush1.bf16.msra.mxu0 %v1002_v44  ;;  %637 = vmatpush1.bf16.msra.mxu1 %v1005_v45  ;;  %v415_v44 = vld [vmem:[%s1305_s4] sm:$0xf] }
  0x63   :  { %598 = vmatprep.subr.bf16.mxu0 %v1010_v46  ;;  %638 = vmatprep.subr.bf16.mxu1 %v1013_v47  ;;  %v420_v45 = vrot.slane %v415_v44, %v110_v4 }
  0x66   :  { %599 = vmatpush1.bf16.msra.mxu0 %v1008_v48  ;;  %639 = vmatpush1.bf16.msra.mxu1 %v1011_v49 }
  0x67   :  { %600 = vmatprep.subr.bf16.mxu0 %v1016_v50  ;;  %640 = vmatprep.subr.bf16.mxu1 %v1019_v51  ;;  %v428_v50 = vrot.slane %v415_v44, %v118_v7 }
  0x6a   :  { %601 = vmatpush1.bf16.msra.mxu0 %v1014_v52  ;;  %641 = vmatpush1.bf16.msra.mxu1 %v1017_v53 }
  0x6b   :  { %602 = vmatprep.subr.bf16.mxu0 %v1022_v54  ;;  %642 = vmatprep.subr.bf16.mxu1 %v1025_v55 }
  0x6e   :  { %603 = vmatpush1.bf16.msra.mxu0 %v1020_v56  ;;  %643 = vmatpush1.bf16.msra.mxu1 %v1023_v57 }
  0x6f   :  { %604 = vmatprep.subr.bf16.mxu0 %v1028_v58  ;;  %644 = vmatprep.subr.bf16.mxu1 %v1031_v59  ;;  %v424_v58 = vrot.slane %v415_v44, %v114_v15 }
  0x72   :  { %605 = vmatpush1.bf16.msra.mxu0 %v1026_v60  ;;  %645 = vmatpush1.bf16.msra.mxu1 %v1029_v61 }
  0x73   :  { %606 = vmatprep.subr.bf16.mxu0 %v1034_v62  ;;  %646 = vmatprep.subr.bf16.mxu1 %v1037_v63 }
  0x76   :  { %607 = vmatpush1.bf16.msra.mxu0 %v1032_v0  ;;  %647 = vmatpush1.bf16.msra.mxu1 %v1035_v1 }
  0x77   :  { %912 = vmatprep.subr.bf16.mxu0 %v1148_v36 }
 0x12b   :  { %v317_v8 = vpop.f32.mrb[0].mxu0  ;;  %v357_v16 = vpop.f32.mrb[0].mxu1 }
 0x12c   :  { %v318_v9 = vadd.f32 %v317_v8, %v111_v6  ;;  %v319_v10 = vpop.f32.mrb[1].mxu0  ;;  %v359_v17 = vpop.f32.mrb[1].mxu1  ;;  %v358_v23 = vadd.f32 %v357_v16, %v115_v20  ;;  %v894_v8 = vld [vmem:[%s1307_s6] ss:$0 sm:$0xff] }
 0x12d   :  { %v320_v11 = vpop.f32.mrb[2].mxu0  ;;  %v360_v18 = vadd.f32 %v359_v17, %v119_v14  ;;  %v361_v19 = vpop.f32.mrb[2].mxu1 }
 0x12e   :  { %v858_v12 = vmul.f32 -1.442695, %v318_v9  ;;  %v321_v13 = vpop.f32.mrb[3].mxu0  ;;  %v362_v21 = vpop.f32.mrb[3].mxu1 }
 0x12f   :  { %v859_v22 = vmul.f32 -1.442695, %v360_v18 }
 0x130   :  { %1046 = vpow2.f32 %v858_v12 }
 0x131   :  { %1048 = vpow2.f32 %v859_v22 }
 0x132   :  { %1050 = vtanh.f32 %v358_v23 }
 0x13a   :  { %v1047_v24 = vpop.eup %1046 }
 0x13b   :  { %v367_v25 = vadd.f32 1.0, %v1047_v24  ;;  %v1049_v26 = vpop.eup %1048 }
 0x13c   :  { %v374_v27 = vadd.f32 1.0, %v1049_v26  ;;  %v1051_v28 = vpop.eup %1050 }
 0x13d   :  { %1052 = vrcp.f32 %v367_v25 }
 0x13e   :  { %1054 = vrcp.f32 %v374_v27 }
 0x147   :  { %v1053_v29 = vpop.eup %1052 }
 0x148   :  { %v377_v30 = vmul.f32 %v1053_v29, %v1051_v28  ;;  %v1055_v32 = vpop.eup %1054 }
 0x14a   :  { %1056 = vtanh.f32 %v377_v30  ;;  %381 = vst [vmem:[%s1310_s9] sm:$0xff] %v377_v30  ;;  %v382_v31 = vpack.c.bf16 %v377_v30, %v377_v30 }
 0x14c   :  { %625 = vmatmul.mubr.bf16.vlgmr.msra.gmra.mrb[4].mxu0 %v382_v31  ;;  %665 = vmatmul.mubr.bf16.vlgmr.msra.gmra.mrb[4].mxu1 %v382_v31 }
 0x14d   :  { %913 = vmatpush3.bf16.msra.mxu0 %v1038_v35  ;;  %928 = vmatprep.mubr.msk.bf16.mxu0 %vm1149_vm0, %v1148_v36 }
 0x14e   :  { %914 = vmatprep.subr.bf16.mxu0 %v1148_v36 }
 0x151   :  { %915 = vmatpush3.bf16.msra.mxu0 %v1039_v37 }
 0x152   :  { %916 = vmatprep.subr.bf16.mxu0 %v1148_v36 }
 0x154   :  { %v1057_v33 = vpop.eup %1056 }
 0x155   :  { %v379_v34 = vmul.f32 %v1057_v33, %v1055_v32  ;;  %917 = vmatpush3.bf16.msra.mxu0 %v1040_v38 }
 0x156   :  { %918 = vmatprep.subr.bf16.mxu0 %v1148_v36 }
 0x157   :  { %380 = vst [vmem:[%s1309_s8] sm:$0xff] %v379_v34 }
 0x159   :  { %919 = vmatpush3.bf16.msra.mxu0 %v1041_v39 }
 0x15a   :  { %920 = vmatprep.subr.bf16.mxu0 %v1148_v36 }
 0x15d   :  { %921 = vmatpush3.bf16.msra.mxu0 %v1042_v40 }
 0x15e   :  { %922 = vmatprep.subr.bf16.mxu0 %v1148_v36 }
 0x161   :  { %923 = vmatpush3.bf16.msra.mxu0 %v1043_v41 }
 0x162   :  { %924 = vmatprep.subr.bf16.mxu0 %v1148_v36 }
 0x165   :  { %925 = vmatpush3.bf16.msra.mxu0 %v1044_v42 }
 0x166   :  { %926 = vmatprep.subr.bf16.mxu0 %v1148_v36 }
 0x169   :  { %927 = vmatpush3.bf16.msra.mxu0 %v1045_v43 }
 0x21f   :  { %v626_v46 = vpop.f32.mrb[4].mxu0  ;;  %v666_v47 = vpop.f32.mrb[4].mxu1 }
 0x220   :  { %v627_v48 = vadd.f32 %v626_v46, %v420_v45  ;;  %v628_v49 = vpop.f32.mrb[5].mxu0  ;;  %v668_v51 = vpop.f32.mrb[5].mxu1  ;;  %v667_v60 = vadd.f32 %v666_v47, %v424_v58 }
 0x221   :  { %v629_v52 = vpop.f32.mrb[6].mxu0  ;;  %v670_v53 = vpop.f32.mrb[6].mxu1  ;;  %v669_v57 = vadd.f32 %v668_v51, %v428_v50 }
 0x222   :  { %v892_v54 = vmul.f32 -1.442695, %v627_v48  ;;  %v630_v55 = vpop.f32.mrb[7].mxu0  ;;  %v671_v56 = vpop.f32.mrb[7].mxu1 }
 0x223   :  { %v893_v59 = vmul.f32 -1.442695, %v669_v57 }
 0x224   :  { %1058 = vpow2.f32 %v892_v54 }
 0x225   :  { %1060 = vpow2.f32 %v893_v59 }
 0x226   :  { %1062 = vtanh.f32 %v667_v60 }
 0x22e   :  { %v1059_v61 = vpop.eup %1058 }
 0x22f   :  { %v676_v62 = vadd.f32 1.0, %v1059_v61  ;;  %v1061_v63 = vpop.eup %1060 }
 0x230   :  { %v683_v0 = vadd.f32 1.0, %v1061_v63  ;;  %v1063_v1 = vpop.eup %1062 }
 0x231   :  { %1064 = vrcp.f32 %v676_v62 }
 0x232   :  { %1066 = vrcp.f32 %v683_v0 }
 0x23b   :  { %v1065_v2 = vpop.eup %1064 }
 0x23c   :  { %v686_v4 = vmul.f32 %v1065_v2, %v1063_v1  ;;  %v1067_v5 = vpop.eup %1066 }
 0x23e   :  { %1068 = vtanh.f32 %v686_v4  ;;  %690 = vst [vmem:[%s1312_s11] sm:$0xff] %v686_v4  ;;  %v691_v3 = vpack.c.bf16 %v686_v4, %v686_v4 }
 0x240   :  { %929 = vmatmul.mubr.bf16.vlgmr.msra.gmra.mrb[8].mxu0 %v691_v3 }
 0x248   :  { %v1069_v6 = vpop.eup %1068 }
 0x249   :  { %v688_v7 = vmul.f32 %v1069_v6, %v1067_v5 }
 0x24b   :  { %689 = vst [vmem:[%s1311_s10] sm:$0xff] %v688_v7 }
 0x313   :  { %v797_v9 = vpop.f32.mrb[8].mxu0 }
 0x314   :  { %v798_v10 = vadd.f32 %v894_v8, %v797_v9  ;;  %v930_v11 = vpop.f32.mrb[9].mxu0 }
 0x315   :  { %v800_v12 = vpop.f32.mrb[10].mxu0 }
 0x316   :  { %803 = vst [vmem:[%s1308_s7] sm:$0xff] %v798_v10  ;;  %v931_v13 = vpop.f32.mrb[11].mxu0 }
 0x317   :  { %824 = vsyncpa [#allocation3], 1 }
 0x318   :  { %825 = vsyncpa [#allocation5], 1 }

</bundles_post_ra>
